<compile_context>
chip_gen: v5e
topology: v5e:2x2
jax: 0.10.0
libtpu: 0.0.40
codegen_flags: <defaults>
</compile_context>

<pallas_src>
import jax
import jax.numpy as jnp
from jax.experimental import pallas as pl
from jax.experimental.pallas import tpu as pltpu

N = 16        # number of graph nodes (adj is N x N)
FEATURE = 8   # hidden width of first GraphConvolution
M = 1         # output width of last GraphConvolution

# Rows of the packed (4, FEATURE) parameter slab (pack_params & kernel share these).
ROW_W1, ROW_B1, ROW_W2T, ROW_B2 = 0, 1, 2, 3

MAX_BLOCK_GRAPHS = 512  # upper bound on graphs per grid step


def gcn_kernel(params_ref, adj_ref, selrow_ref, selrep_ref, out_ref):
    """Fused 2-layer GCN forward for a block of G graphs.

    adj_ref    : (G, N*N) f32 — G adjacencies, each flattened row-major (i*N+k).
    selrow_ref : (N*N, N) f32 — segment-sum selector, [j, i] = 1 iff j // N == i.
    selrep_ref : (N, N*N) f32 — replication selector, [k, j] = 1 iff j %  N == k.
    params_ref : (4, FEATURE) f32 — packed [w1; b1; w2^T; b2 in col 0].
    out_ref    : (G, N) f32 — per-graph softmax over nodes.
    """
    adj = adj_ref[...]                       # (G, N*N), full 128-lane utilization
    sel_row = selrow_ref[...]                # (N*N, N)
    sel_rep = selrep_ref[...]                # (N, N*N)
    p = params_ref[...]                      # (4, FEATURE)

    # --- layer 0 (1 -> F) with x = ones((N,1)) ---
    # adj @ (ones @ w1) + b1 == rowsum(adj)[:, None] * w1 + b1.
    # One block-wide MXU matmul computes rowsum for all G graphs at once and
    # lands the node axis in lanes: r[g, i] = sum_k adj[g, i*N + k].
    r = jnp.dot(adj, sel_row, preferred_element_type=jnp.float32)      # (G, N)

    # v = relu(r * w1 + b1) @ w2, unrolled over the F=8 hidden units so every
    # op stays in the 2-D (G, N) layout (no (G, N, F) relayouts).
    v = jnp.zeros_like(r)
    for f in range(FEATURE):
        w1f = p[ROW_W1:ROW_W1 + 1, f:f + 1]                            # (1, 1)
        b1f = p[ROW_B1:ROW_B1 + 1, f:f + 1]
        w2f = p[ROW_W2T:ROW_W2T + 1, f:f + 1]
        v = v + jnp.maximum(r * w1f + b1f, 0.0) * w2f                  # (G, N)

    # --- layer 1 (F -> 1): h2[g, i] = sum_k adj[g, i, k] * v[g, k] + b2 ---
    # Replicate v along lanes (v_big[g, i*N+k] = v[g, k]) with a tiny MXU
    # matmul, do the elementwise product at full lane width, then the same
    # selector matmul performs the per-node segment sum (== adj @ v per graph).
    v_big = jnp.dot(v, sel_rep, preferred_element_type=jnp.float32)    # (G, N*N)
    b2 = p[ROW_B2:ROW_B2 + 1, 0:1]                                     # (1, 1)
    h2 = jnp.dot(adj * v_big, sel_row,
                 preferred_element_type=jnp.float32) + b2              # (G, N)

    # softmax over nodes (dim=0 of each graph's (N, 1) output == lane axis here)
    mx = jnp.max(h2, axis=-1, keepdims=True)
    e = jnp.exp(h2 - mx)
    out_ref[...] = e / jnp.sum(e, axis=-1, keepdims=True)


def _round_up(x, m):
    return (x + m - 1) // m * m


def _choose_block_graphs(b):
    # Multiple of 8, capped at MAX_BLOCK_GRAPHS; keep >= 2 grid steps when
    # possible so both v7x TensorCores get work (no-op on v5e/v6e).
    if b <= 8:
        return 8
    return max(8, min(MAX_BLOCK_GRAPHS, _round_up((b + 1) // 2, 8)))


def _make_selectors(n):
    j = jnp.arange(n * n, dtype=jnp.int32)
    i = jnp.arange(n, dtype=jnp.int32)
    sel_row = (j[:, None] // n == i[None, :]).astype(jnp.float32)   # (n*n, n)
    sel_rep = (j[None, :] % n == i[:, None]).astype(jnp.float32)    # (n, n*n)
    return sel_row, sel_rep


def gcn_forward_batched(adj_b, params):
    """adj_b: (B, N, N) f32, params: (4, FEATURE) f32 -> (B, N, M) f32."""
    b = adj_b.shape[0]
    assert adj_b.shape[1:] == (N, N)
    g = _choose_block_graphs(b)
    b_pad = _round_up(b, g)

    adj_flat = adj_b.reshape(b, N * N).astype(jnp.float32)
    if b_pad != b:
        adj_flat = jnp.pad(adj_flat, ((0, b_pad - b), (0, 0)))
    sel_row, sel_rep = _make_selectors(N)

    out = pl.pallas_call(
        gcn_kernel,
        out_shape=jax.ShapeDtypeStruct((b_pad, N), jnp.float32),
        grid_spec=pltpu.PrefetchScalarGridSpec(
            num_scalar_prefetch=0,
            grid=(b_pad // g,),
            in_specs=[
                pl.BlockSpec((4, FEATURE), lambda i: (0, 0)),      # params
                pl.BlockSpec((g, N * N), lambda i: (i, 0)),        # adj block
                pl.BlockSpec((N * N, N), lambda i: (0, 0)),        # sel_row
                pl.BlockSpec((N, N * N), lambda i: (0, 0)),        # sel_rep
            ],
            out_specs=pl.BlockSpec((g, N), lambda i: (i, 0)),
        ),
        compiler_params=pltpu.CompilerParams(
            dimension_semantics=("parallel",)),
    )(params, adj_flat, sel_row, sel_rep)

    return out[:b].reshape(b, N, M)


def gcn_forward(adj, params):
    """Single-graph forward matching GCN.forward(adj): (N, N) -> (N, M)."""
    return gcn_forward_batched(adj[None], params)[0]


def pack_params(w1, b1, w2, b2):
    """Pack (1,F) w1, (1,F) b1, (F,1) w2, (1,1) b2 into one (4, F) f32 slab."""
    b2_row = jnp.zeros((1, FEATURE), jnp.float32).at[0, 0].set(b2[0, 0])
    rows = [None] * 4
    rows[ROW_W1] = w1
    rows[ROW_B1] = b1
    rows[ROW_W2T] = w2.T
    rows[ROW_B2] = b2_row
    return jnp.concatenate(rows, axis=0).astype(jnp.float32)


def init_params(key):
    # Mirrors GraphConvolution.reset_parameters: uniform(-stdv, stdv),
    # stdv = 1/sqrt(out_features).
    k1, k2, k3, k4 = jax.random.split(key, 4)
    stdv1 = 1.0 / jnp.sqrt(jnp.float32(FEATURE))
    stdv2 = 1.0 / jnp.sqrt(jnp.float32(M))
    w1 = jax.random.uniform(k1, (1, FEATURE), jnp.float32, -stdv1, stdv1)
    b1 = jax.random.uniform(k2, (1, FEATURE), jnp.float32, -stdv1, stdv1)
    w2 = jax.random.uniform(k3, (FEATURE, M), jnp.float32, -stdv2, stdv2)
    b2 = jax.random.uniform(k4, (1, M), jnp.float32, -stdv2, stdv2)
    return w1, b1, w2, b2


def make_adj(key, n):
    # Deterministic synthetic symmetric-normalized adjacency with self loops.
    a = jax.random.uniform(key, (n, n), jnp.float32)
    a = (a + a.T) * 0.5 + jnp.eye(n, dtype=jnp.float32)
    deg = jnp.sum(a, axis=1, keepdims=True)
    return a / jnp.sqrt(deg) / jnp.sqrt(deg.T)


def gcn_reference(adj, w1, b1, w2, b2):
    x = jnp.ones((adj.shape[0], 1), jnp.float32)
    h1 = jnp.maximum(adj @ (x @ w1) + b1, 0.0)
    h2 = adj @ (h1 @ w2) + b2
    return jax.nn.softmax(h2, axis=0)


if __name__ == "__main__":
    key = jax.random.PRNGKey(0)
    k_adj, k_par = jax.random.split(key)

    w1, b1, w2, b2 = init_params(k_par)
    params = pack_params(w1, b1, w2, b2)

    # --- single-graph forward (original module semantics: adj -> (N, M)) ---
    adj = make_adj(k_adj, N)
    out = jax.block_until_ready(gcn_forward(adj, params))
    ref = gcn_reference(adj, w1, b1, w2, b2)
    assert out.shape == (N, M)
    assert jnp.allclose(out, ref, atol=1e-5, rtol=1e-5)
    assert jnp.allclose(jnp.sum(out, axis=0), 1.0, atol=1e-5)

    # --- batched forward: B graphs, 128 graphs per grid step, 2 grid steps ---
    B = 256
    adj_keys = jax.random.split(k_adj, B)
    adj_b = jax.vmap(make_adj, in_axes=(0, None))(adj_keys, N)
    out_b = jax.block_until_ready(gcn_forward_batched(adj_b, params))
    ref_b = jax.vmap(gcn_reference, in_axes=(0, None, None, None, None))(
        adj_b, w1, b1, w2, b2)
    assert out_b.shape == (B, N, M)
    assert jnp.allclose(out_b, ref_b, atol=1e-5, rtol=1e-5)
    assert jnp.allclose(jnp.sum(out_b, axis=1), 1.0, atol=1e-5)

    print("KERNEL_OK")
</pallas_src>

<mosaic_0001>
module attributes {stable_mosaic.version = 11 : i64} {
  func.func @gcn_kernel(%arg0: i32, %arg1: memref<4x8xf32, #tpu.memory_space<vmem>>, %arg2: memref<8x256xf32, #tpu.memory_space<vmem>>, %arg3: memref<256x16xf32, #tpu.memory_space<vmem>>, %arg4: memref<16x256xf32, #tpu.memory_space<vmem>>, %arg5: memref<8x16xf32, #tpu.memory_space<vmem>>) attributes {dimension_semantics = [#tpu.dimension_semantics<parallel>], iteration_bounds = array<i64: 1>, scalar_prefetch = 0 : i64, scratch_operands = 0 : i64, tpu.core_type = #tpu.core_type<tc>, window_params = [{pipeline_mode = #tpu.pipeline_mode<synchronous>, transform_indices = @transform_0, window_bounds = array<i64: 4, 8>}, {transform_indices = @transform_1, window_bounds = array<i64: 8, 256>}, {pipeline_mode = #tpu.pipeline_mode<synchronous>, transform_indices = @transform_2, window_bounds = array<i64: 256, 16>}, {pipeline_mode = #tpu.pipeline_mode<synchronous>, transform_indices = @transform_3, window_bounds = array<i64: 16, 256>}, {transform_indices = @transform_4, window_bounds = array<i64: 8, 16>}]} {
    %c0 = arith.constant 0 : index
    %c0_0 = arith.constant 0 : index
    %0 = vector.load %arg2[%c0, %c0_0] : memref<8x256xf32, #tpu.memory_space<vmem>>, vector<8x256xf32>
    %c0_1 = arith.constant 0 : index
    %c0_2 = arith.constant 0 : index
    %1 = vector.load %arg3[%c0_1, %c0_2] : memref<256x16xf32, #tpu.memory_space<vmem>>, vector<256x16xf32>
    %c0_3 = arith.constant 0 : index
    %c0_4 = arith.constant 0 : index
    %2 = vector.load %arg4[%c0_3, %c0_4] : memref<16x256xf32, #tpu.memory_space<vmem>>, vector<16x256xf32>
    %c0_5 = arith.constant 0 : index
    %c0_6 = arith.constant 0 : index
    %3 = vector.load %arg1[%c0_5, %c0_6] : memref<4x8xf32, #tpu.memory_space<vmem>>, vector<4x8xf32>
    %cst = arith.constant dense<0.000000e+00> : vector<8x16xf32>
    %4 = tpu.matmul %0, %1, %cst {dimension_numbers = #tpu.dot_dimension_numbers<[1], [0], [0], [1], [0, 0, 1, 1], [], []>} : vector<8x256xf32>, vector<256x16xf32>, vector<8x16xf32> -> vector<8x16xf32>
    %cst_7 = arith.constant 0.000000e+00 : f32
    %5 = vector.broadcast %cst_7 : f32 to vector<8x16xf32>
    %6 = vector.extract_strided_slice %3 {offsets = [0, 0], sizes = [1, 1], strides = [1, 1]} : vector<4x8xf32> to vector<1x1xf32>
    %7 = vector.extract_strided_slice %3 {offsets = [1, 0], sizes = [1, 1], strides = [1, 1]} : vector<4x8xf32> to vector<1x1xf32>
    %8 = vector.extract_strided_slice %3 {offsets = [2, 0], sizes = [1, 1], strides = [1, 1]} : vector<4x8xf32> to vector<1x1xf32>
    %9 = vector.broadcast %6 : vector<1x1xf32> to vector<8x16xf32>
    %10 = arith.mulf %4, %9 : vector<8x16xf32>
    %11 = vector.broadcast %7 : vector<1x1xf32> to vector<8x16xf32>
    %12 = arith.addf %10, %11 : vector<8x16xf32>
    %cst_8 = arith.constant 0.000000e+00 : f32
    %13 = vector.broadcast %cst_8 : f32 to vector<8x16xf32>
    %14 = arith.maximumf %12, %13 : vector<8x16xf32>
    %15 = vector.broadcast %8 : vector<1x1xf32> to vector<8x16xf32>
    %16 = arith.mulf %14, %15 : vector<8x16xf32>
    %17 = arith.addf %5, %16 : vector<8x16xf32>
    %18 = vector.extract_strided_slice %3 {offsets = [0, 1], sizes = [1, 1], strides = [1, 1]} : vector<4x8xf32> to vector<1x1xf32>
    %19 = vector.extract_strided_slice %3 {offsets = [1, 1], sizes = [1, 1], strides = [1, 1]} : vector<4x8xf32> to vector<1x1xf32>
    %20 = vector.extract_strided_slice %3 {offsets = [2, 1], sizes = [1, 1], strides = [1, 1]} : vector<4x8xf32> to vector<1x1xf32>
    %21 = vector.broadcast %18 : vector<1x1xf32> to vector<8x16xf32>
    %22 = arith.mulf %4, %21 : vector<8x16xf32>
    %23 = vector.broadcast %19 : vector<1x1xf32> to vector<8x16xf32>
    %24 = arith.addf %22, %23 : vector<8x16xf32>
    %cst_9 = arith.constant 0.000000e+00 : f32
    %25 = vector.broadcast %cst_9 : f32 to vector<8x16xf32>
    %26 = arith.maximumf %24, %25 : vector<8x16xf32>
    %27 = vector.broadcast %20 : vector<1x1xf32> to vector<8x16xf32>
    %28 = arith.mulf %26, %27 : vector<8x16xf32>
    %29 = arith.addf %17, %28 : vector<8x16xf32>
    %30 = vector.extract_strided_slice %3 {offsets = [0, 2], sizes = [1, 1], strides = [1, 1]} : vector<4x8xf32> to vector<1x1xf32>
    %31 = vector.extract_strided_slice %3 {offsets = [1, 2], sizes = [1, 1], strides = [1, 1]} : vector<4x8xf32> to vector<1x1xf32>
    %32 = vector.extract_strided_slice %3 {offsets = [2, 2], sizes = [1, 1], strides = [1, 1]} : vector<4x8xf32> to vector<1x1xf32>
    %33 = vector.broadcast %30 : vector<1x1xf32> to vector<8x16xf32>
    %34 = arith.mulf %4, %33 : vector<8x16xf32>
    %35 = vector.broadcast %31 : vector<1x1xf32> to vector<8x16xf32>
    %36 = arith.addf %34, %35 : vector<8x16xf32>
    %cst_10 = arith.constant 0.000000e+00 : f32
    %37 = vector.broadcast %cst_10 : f32 to vector<8x16xf32>
    %38 = arith.maximumf %36, %37 : vector<8x16xf32>
    %39 = vector.broadcast %32 : vector<1x1xf32> to vector<8x16xf32>
    %40 = arith.mulf %38, %39 : vector<8x16xf32>
    %41 = arith.addf %29, %40 : vector<8x16xf32>
    %42 = vector.extract_strided_slice %3 {offsets = [0, 3], sizes = [1, 1], strides = [1, 1]} : vector<4x8xf32> to vector<1x1xf32>
    %43 = vector.extract_strided_slice %3 {offsets = [1, 3], sizes = [1, 1], strides = [1, 1]} : vector<4x8xf32> to vector<1x1xf32>
    %44 = vector.extract_strided_slice %3 {offsets = [2, 3], sizes = [1, 1], strides = [1, 1]} : vector<4x8xf32> to vector<1x1xf32>
    %45 = vector.broadcast %42 : vector<1x1xf32> to vector<8x16xf32>
    %46 = arith.mulf %4, %45 : vector<8x16xf32>
    %47 = vector.broadcast %43 : vector<1x1xf32> to vector<8x16xf32>
    %48 = arith.addf %46, %47 : vector<8x16xf32>
    %cst_11 = arith.constant 0.000000e+00 : f32
    %49 = vector.broadcast %cst_11 : f32 to vector<8x16xf32>
    %50 = arith.maximumf %48, %49 : vector<8x16xf32>
    %51 = vector.broadcast %44 : vector<1x1xf32> to vector<8x16xf32>
    %52 = arith.mulf %50, %51 : vector<8x16xf32>
    %53 = arith.addf %41, %52 : vector<8x16xf32>
    %54 = vector.extract_strided_slice %3 {offsets = [0, 4], sizes = [1, 1], strides = [1, 1]} : vector<4x8xf32> to vector<1x1xf32>
    %55 = vector.extract_strided_slice %3 {offsets = [1, 4], sizes = [1, 1], strides = [1, 1]} : vector<4x8xf32> to vector<1x1xf32>
    %56 = vector.extract_strided_slice %3 {offsets = [2, 4], sizes = [1, 1], strides = [1, 1]} : vector<4x8xf32> to vector<1x1xf32>
    %57 = vector.broadcast %54 : vector<1x1xf32> to vector<8x16xf32>
    %58 = arith.mulf %4, %57 : vector<8x16xf32>
    %59 = vector.broadcast %55 : vector<1x1xf32> to vector<8x16xf32>
    %60 = arith.addf %58, %59 : vector<8x16xf32>
    %cst_12 = arith.constant 0.000000e+00 : f32
    %61 = vector.broadcast %cst_12 : f32 to vector<8x16xf32>
    %62 = arith.maximumf %60, %61 : vector<8x16xf32>
    %63 = vector.broadcast %56 : vector<1x1xf32> to vector<8x16xf32>
    %64 = arith.mulf %62, %63 : vector<8x16xf32>
    %65 = arith.addf %53, %64 : vector<8x16xf32>
    %66 = vector.extract_strided_slice %3 {offsets = [0, 5], sizes = [1, 1], strides = [1, 1]} : vector<4x8xf32> to vector<1x1xf32>
    %67 = vector.extract_strided_slice %3 {offsets = [1, 5], sizes = [1, 1], strides = [1, 1]} : vector<4x8xf32> to vector<1x1xf32>
    %68 = vector.extract_strided_slice %3 {offsets = [2, 5], sizes = [1, 1], strides = [1, 1]} : vector<4x8xf32> to vector<1x1xf32>
    %69 = vector.broadcast %66 : vector<1x1xf32> to vector<8x16xf32>
    %70 = arith.mulf %4, %69 : vector<8x16xf32>
    %71 = vector.broadcast %67 : vector<1x1xf32> to vector<8x16xf32>
    %72 = arith.addf %70, %71 : vector<8x16xf32>
    %cst_13 = arith.constant 0.000000e+00 : f32
    %73 = vector.broadcast %cst_13 : f32 to vector<8x16xf32>
    %74 = arith.maximumf %72, %73 : vector<8x16xf32>
    %75 = vector.broadcast %68 : vector<1x1xf32> to vector<8x16xf32>
    %76 = arith.mulf %74, %75 : vector<8x16xf32>
    %77 = arith.addf %65, %76 : vector<8x16xf32>
    %78 = vector.extract_strided_slice %3 {offsets = [0, 6], sizes = [1, 1], strides = [1, 1]} : vector<4x8xf32> to vector<1x1xf32>
    %79 = vector.extract_strided_slice %3 {offsets = [1, 6], sizes = [1, 1], strides = [1, 1]} : vector<4x8xf32> to vector<1x1xf32>
    %80 = vector.extract_strided_slice %3 {offsets = [2, 6], sizes = [1, 1], strides = [1, 1]} : vector<4x8xf32> to vector<1x1xf32>
    %81 = vector.broadcast %78 : vector<1x1xf32> to vector<8x16xf32>
    %82 = arith.mulf %4, %81 : vector<8x16xf32>
    %83 = vector.broadcast %79 : vector<1x1xf32> to vector<8x16xf32>
    %84 = arith.addf %82, %83 : vector<8x16xf32>
    %cst_14 = arith.constant 0.000000e+00 : f32
    %85 = vector.broadcast %cst_14 : f32 to vector<8x16xf32>
    %86 = arith.maximumf %84, %85 : vector<8x16xf32>
    %87 = vector.broadcast %80 : vector<1x1xf32> to vector<8x16xf32>
    %88 = arith.mulf %86, %87 : vector<8x16xf32>
    %89 = arith.addf %77, %88 : vector<8x16xf32>
    %90 = vector.extract_strided_slice %3 {offsets = [0, 7], sizes = [1, 1], strides = [1, 1]} : vector<4x8xf32> to vector<1x1xf32>
    %91 = vector.extract_strided_slice %3 {offsets = [1, 7], sizes = [1, 1], strides = [1, 1]} : vector<4x8xf32> to vector<1x1xf32>
    %92 = vector.extract_strided_slice %3 {offsets = [2, 7], sizes = [1, 1], strides = [1, 1]} : vector<4x8xf32> to vector<1x1xf32>
    %93 = vector.broadcast %90 : vector<1x1xf32> to vector<8x16xf32>
    %94 = arith.mulf %4, %93 : vector<8x16xf32>
    %95 = vector.broadcast %91 : vector<1x1xf32> to vector<8x16xf32>
    %96 = arith.addf %94, %95 : vector<8x16xf32>
    %cst_15 = arith.constant 0.000000e+00 : f32
    %97 = vector.broadcast %cst_15 : f32 to vector<8x16xf32>
    %98 = arith.maximumf %96, %97 : vector<8x16xf32>
    %99 = vector.broadcast %92 : vector<1x1xf32> to vector<8x16xf32>
    %100 = arith.mulf %98, %99 : vector<8x16xf32>
    %101 = arith.addf %89, %100 : vector<8x16xf32>
    %cst_16 = arith.constant dense<0.000000e+00> : vector<8x256xf32>
    %102 = tpu.matmul %101, %2, %cst_16 {dimension_numbers = #tpu.dot_dimension_numbers<[1], [0], [0], [1], [0, 0, 1, 1], [], []>} : vector<8x16xf32>, vector<16x256xf32>, vector<8x256xf32> -> vector<8x256xf32>
    %103 = vector.extract_strided_slice %3 {offsets = [3, 0], sizes = [1, 1], strides = [1, 1]} : vector<4x8xf32> to vector<1x1xf32>
    %104 = arith.mulf %0, %102 : vector<8x256xf32>
    %cst_17 = arith.constant dense<0.000000e+00> : vector<8x16xf32>
    %105 = tpu.matmul %104, %1, %cst_17 {dimension_numbers = #tpu.dot_dimension_numbers<[1], [0], [0], [1], [0, 0, 1, 1], [], []>} : vector<8x256xf32>, vector<256x16xf32>, vector<8x16xf32> -> vector<8x16xf32>
    %106 = vector.broadcast %103 : vector<1x1xf32> to vector<8x16xf32>
    %107 = arith.addf %105, %106 : vector<8x16xf32>
    %cst_18 = arith.constant dense<0xFF800000> : vector<8xf32>
    %108 = vector.multi_reduction <maximumf>, %107, %cst_18 [1] : vector<8x16xf32> to vector<8xf32>
    %109 = vector.shape_cast %108 : vector<8xf32> to vector<8x1xf32>
    %110 = vector.broadcast %109 : vector<8x1xf32> to vector<8x16xf32>
    %111 = arith.subf %107, %110 : vector<8x16xf32>
    %112 = math.exp %111 : vector<8x16xf32>
    %cst_19 = arith.constant dense<0.000000e+00> : vector<8xf32>
    %113 = vector.multi_reduction <add>, %112, %cst_19 [1] : vector<8x16xf32> to vector<8xf32>
    %114 = vector.shape_cast %113 : vector<8xf32> to vector<8x1xf32>
    %115 = vector.broadcast %114 : vector<8x1xf32> to vector<8x16xf32>
    %116 = arith.divf %112, %115 : vector<8x16xf32>
    %c0_20 = arith.constant 0 : index
    %c0_21 = arith.constant 0 : index
    %117 = vector.load %arg5[%c0_20, %c0_21] : memref<8x16xf32, #tpu.memory_space<vmem>>, vector<8x16xf32>
    tpu.vector_store %arg5[%c0_20, %c0_21], %116 {strides = array<i32>} : memref<8x16xf32, #tpu.memory_space<vmem>>, vector<8x16xf32>,
    return
  }
  func.func @transform_0(%arg0: i32) -> (i32, i32) {
    %c0_i32 = arith.constant 0 : i32
    %c0_i32_0 = arith.constant 0 : i32
    %c0_i32_1 = arith.constant 0 : i32
    return %c0_i32, %c0_i32_0 : i32, i32
  }
  func.func @transform_1(%arg0: i32) -> (i32, i32) {
    %c0_i32 = arith.constant 0 : i32
    %c0_i32_0 = arith.constant 0 : i32
    return %arg0, %c0_i32 : i32, i32
  }
  func.func @transform_2(%arg0: i32) -> (i32, i32) {
    %c0_i32 = arith.constant 0 : i32
    %c0_i32_0 = arith.constant 0 : i32
    %c0_i32_1 = arith.constant 0 : i32
    return %c0_i32, %c0_i32_0 : i32, i32
  }
  func.func @transform_3(%arg0: i32) -> (i32, i32) {
    %c0_i32 = arith.constant 0 : i32
    %c0_i32_0 = arith.constant 0 : i32
    %c0_i32_1 = arith.constant 0 : i32
    return %c0_i32, %c0_i32_0 : i32, i32
  }
  func.func @transform_4(%arg0: i32) -> (i32, i32) {
    %c0_i32 = arith.constant 0 : i32
    %c0_i32_0 = arith.constant 0 : i32
    return %arg0, %c0_i32 : i32, i32
  }
}

</mosaic_0001>

<bundles_post_ra>
// kernel: tpu_custom_call.1
= control target key start
LH: loop header
LB: loop body
LE: loop exit
PB: predicated region body
PF: predicated region fallthrough
CT: control target
= control target key end

     0   :  { %s475_s21 = smov 127   ;;  %s476_s5 = smov 126   ;;  %s854_s0 = inlined_call_operand.vmem [shape: f32[4,8], index: 0, kind: input, shape index: {}]   ;;  %s855_s1 = inlined_call_operand.vmem [shape: f32[8,256], index: 1, kind: input, shape index: {}]   ;;  %s856_s2 = inlined_call_operand.vmem [shape: f32[256,16], index: 2, kind: input, shape index: {}]   ;;  %s857_s3 = inlined_call_operand.vmem [shape: f32[16,256], index: 3, kind: input, shape index: {}]   ;;  %s858_s4 = inlined_call_operand.hbm [shape: f32[8,16], index: 4, kind: output, shape index: {}]  }
   0x1   :  { %v511_v0 = vld [vmem:[%s854_s0] sm:$0xf]  ;;  %v516_v1 = vld [vmem:[%s856_s2 + $0x78] sm:$0xff]  ;;  %v534_v5 = vld [vmem:[%s856_s2 + $0x70] sm:$0xff] }
   0x2   :  { %v521_v2 = vld [vmem:[%s856_s2 + $0xf8] sm:$0xff]  ;;  %114 = vrot.lane.b32.xlu0 %v511_v0, %s475_s21  ;;  %v525_v3 = vrot.slane %v511_v0, 2  ;;  %57 = vmatpush.msra.mxu0 %v516_v1  ;;  %v529_v4 = vrot.slane %v511_v0, 1  ;;  %v539_v6 = vld [vmem:[%s856_s2 + $0xf0] sm:$0xff]  ;;  %387 = vpush %v511_v0  ;;  %v546_v7 = vld [vmem:[%s856_s2 + $0x68] sm:$0xff] }
   0x3   :  { %77 = vmatpush.msra.mxu1 %v521_v2  ;;  %v553_v8 = vld [vmem:[%s856_s2 + $0xe8] sm:$0xff]  ;;  %v560_v9 = vld [vmem:[%s856_s2 + $0x60] sm:$0xff]  ;;  %v574_v11 = vld [vmem:[%s856_s2 + $0x58] sm:$0xff] }
   0x4   :  { %127 = vrot.lane.b32.xlu1 %v525_v3, %s475_s21  ;;  %58 = vmatpush.msra.mxu0 %v534_v5  ;;  %389 = vpush %v529_v4  ;;  %v568_v10 = vld [vmem:[%s856_s2 + $0xe0] sm:$0xff]  ;;  %v580_v12 = vld [vmem:[%s856_s2 + $0xd8] sm:$0xff]  ;;  %v586_v13 = vld [vmem:[%s856_s2 + $0x50] sm:$0xff] }
   0x5   :  { %78 = vmatpush.msra.mxu1 %v539_v6  ;;  %140 = vrot.lane.b32.xlu2 %v529_v4, %s476_s5  ;;  %391 = vpush %v525_v3  ;;  %v593_v14 = vld [vmem:[%s856_s2 + $0xd0] sm:$0xff]  ;;  %v599_v15 = vld [vmem:[%s856_s2 + $0x48] sm:$0xff] }
   0x6   :  { %59 = vmatpush.msra.mxu0 %v546_v7  ;;  %v606_v16 = vld [vmem:[%s856_s2 + $0xc8] sm:$0xff] }
   0x7   :  { %79 = vmatpush.msra.mxu1 %v553_v8 }
   0x8   :  { %60 = vmatpush.msra.mxu0 %v560_v9 }
   0x9   :  { %80 = vmatpush.msra.mxu1 %v568_v10 }
   0xa   :  { %120 = vrot.lane.b32.xlu0 %v529_v4, %s475_s21  ;;  %61 = vmatpush.msra.mxu0 %v574_v11 }
   0xb   :  { %81 = vmatpush.msra.mxu1 %v580_v12 }
   0xc   :  { %134 = vrot.lane.b32.xlu1 %v511_v0, %s476_s5  ;;  %62 = vmatpush.msra.mxu0 %v586_v13 }
   0xd   :  { %9 = vsyncpa [#allocation3], 0  ;;  %82 = vmatpush.msra.mxu1 %v593_v14  ;;  %v612_v17 = vld [vmem:[%s856_s2 + $0x40] sm:$0xff]  ;;  %147 = vrot.lane.b32.xlu2 %v525_v3, %s476_s5  ;;  %v625_v19 = vld [vmem:[%s856_s2 + $0x38] sm:$0xff]  ;;  %s477_s29 = smov 125   ;;  %s478_s20 = smov 124  }
   0xe   :  { %63 = vmatpush.msra.mxu0 %v599_v15  ;;  %v619_v18 = vld [vmem:[%s856_s2 + $0xc0] sm:$0xff]  ;;  %v631_v20 = vld [vmem:[%s856_s2 + $0xb8] sm:$0xff]  ;;  %v637_v21 = vld [vmem:[%s856_s2 + $0x30] sm:$0xff]  ;;  %s480_s8 = smov 122   ;;  %vm254_vm0 = vcmask 130048  }
   0xf   :  { %83 = vmatpush.msra.mxu1 %v606_v16  ;;  %v644_v22 = vld [vmem:[%s856_s2 + $0xb0] sm:$0xff]  ;;  %v650_v23 = vld [vmem:[%s856_s2 + $0x28] sm:$0xff]  ;;  %v663_v25 = vld [vmem:[%s856_s2 + $0x20] sm:$0xff] }
  0x10   :  { %64 = vmatpush.msra.mxu0 %v612_v17  ;;  %v657_v24 = vld [vmem:[%s856_s2 + $0xa8] sm:$0xff]  ;;  %v670_v26 = vld [vmem:[%s856_s2 + $0xa0] sm:$0xff]  ;;  %v676_v27 = vld [vmem:[%s856_s2 + $0x18] sm:$0xff] }
  0x11   :  { %84 = vmatpush.msra.mxu1 %v619_v18  ;;  %v682_v28 = vld [vmem:[%s856_s2 + $0x98] sm:$0xff]  ;;  %v688_v29 = vld [vmem:[%s856_s2 + $0x10] sm:$0xff]  ;;  %v701_v31 = vld [vmem:[%s856_s2 + $0x8] sm:$0xff] }
  0x12   :  { %154 = vrot.lane.b32.xlu0 %v511_v0, %s477_s29  ;;  %65 = vmatpush.msra.mxu0 %v625_v19  ;;  %v695_v30 = vld [vmem:[%s856_s2 + $0x90] sm:$0xff]  ;;  %v708_v32 = vld [vmem:[%s856_s2 + $0x88] sm:$0xff]  ;;  %v714_v33 = vld [vmem:[%s856_s2] sm:$0xff] }
  0x13   :  { %85 = vmatpush.msra.mxu1 %v631_v20  ;;  %v721_v34 = vld [vmem:[%s856_s2 + $0x80] sm:$0xff]  ;;  %v732_v36 = vld [vmem:[%s855_s1 + $0x8] sm:$0xff]  ;;  %s479_s2 = smov 123   ;;  %v54_v60 = vld [vmem:[%s857_s3 + $0x10] sm:$0xff] }
  0x14   :  { %160 = vrot.lane.b32.xlu1 %v529_v4, %s477_s29  ;;  %66 = vmatpush.msra.mxu0 %v637_v21  ;;  %v726_v35 = vld [vmem:[%s855_s1] sm:$0xff]  ;;  %s481_s1 = smov 121   ;;  %v55_v61 = vld [vmem:[%s857_s3 + $0x18] sm:$0xff] }
  0x15   :  { %86 = vmatpush.msra.mxu1 %v644_v22  ;;  %167 = vrot.lane.b32.xlu2 %v525_v3, %s477_s29  ;;  %v52_v63 = vld [vmem:[%s857_s3] sm:$0xff] }
  0x16   :  { %67 = vmatpush.msra.mxu0 %v650_v23  ;;  %272 = vmatpush.msra.mxu2 %v54_v60 }
  0x17   :  { %87 = vmatpush.msra.mxu1 %v657_v24  ;;  %292 = vmatpush.msra.mxu3 %v55_v61 }
  0x18   :  { %68 = vmatpush.msra.mxu0 %v663_v25  ;;  %273 = vmatpush.msra.mxu2 %v52_v63 }
  0x19   :  { %88 = vmatpush.msra.mxu1 %v670_v26 }
  0x1a   :  { %174 = vrot.lane.b32.xlu0 %v511_v0, %s478_s20  ;;  %69 = vmatpush.msra.mxu0 %v676_v27 }
  0x1b   :  { %89 = vmatpush.msra.mxu1 %v682_v28  ;;  %304 = vmatpush.msrb.mxu2 %v516_v1 }
  0x1c   :  { %180 = vrot.lane.b32.xlu1 %v529_v4, %s478_s20  ;;  %70 = vmatpush.msra.mxu0 %v688_v29 }
  0x1d   :  { %90 = vmatpush.msra.mxu1 %v695_v30  ;;  %187 = vrot.lane.b32.xlu2 %v525_v3, %s478_s20 }
  0x1e   :  { %71 = vmatpush.msra.mxu0 %v701_v31  ;;  %305 = vmatpush.msrb.mxu2 %v534_v5 }
  0x1f   :  { %91 = vmatpush.msra.mxu1 %v708_v32 }
  0x20   :  { %72 = vmatpush.msra.mxu0 %v714_v33  ;;  %306 = vmatpush.msrb.mxu2 %v546_v7 }
  0x21   :  { %92 = vmatpush.msra.mxu1 %v721_v34  ;;  %73 = vmatmul.f32.vlgmr.msra.gmra.mxu0 %v726_v35 }
  0x22   :  { %194 = vrot.lane.b32.xlu0 %v511_v0, %s479_s2  ;;  %93 = vmatmul.f32.vlgmr.msra.gmra.mxu1 %v732_v36 }
  0x23   :  { %307 = vmatpush.msrb.mxu2 %v560_v9 }
  0x24   :  { %200 = vrot.lane.b32.xlu1 %v529_v4, %s479_s2 }
  0x25   :  { %207 = vrot.lane.b32.xlu2 %v525_v3, %s479_s2  ;;  %308 = vmatpush.msrb.mxu2 %v574_v11 }
  0x27   :  { %309 = vmatpush.msrb.mxu2 %v586_v13 }
  0x29   :  { %310 = vmatpush.msrb.mxu2 %v599_v15 }
  0x2a   :  { %214 = vrot.lane.b32.xlu0 %v511_v0, %s480_s8 }
  0x2b   :  { %311 = vmatpush.msrb.mxu2 %v612_v17 }
  0x2c   :  { %220 = vrot.lane.b32.xlu1 %v529_v4, %s480_s8 }
  0x2d   :  { %227 = vrot.lane.b32.xlu2 %v525_v3, %s480_s8  ;;  %312 = vmatpush.msrb.mxu2 %v625_v19 }
  0x2f   :  { %313 = vmatpush.msrb.mxu2 %v637_v21 }
  0x31   :  { %314 = vmatpush.msrb.mxu2 %v650_v23 }
  0x32   :  { %234 = vrot.lane.b32.xlu0 %v511_v0, %s481_s1 }
  0x33   :  { %s388_s9 = spop %387  ;;  %315 = vmatpush.msrb.mxu2 %v663_v25 }
  0x34   :  { %240 = vrot.lane.b32.xlu1 %v529_v4, %s481_s1  ;;  %v99_v62 = vstv %s388_s9 }
  0x35   :  { %247 = vrot.lane.b32.xlu2 %v525_v3, %s481_s1  ;;  %s747_s10 = spop %389  ;;  %v53_v3 = vld [vmem:[%s857_s3 + $0x8] sm:$0xff]  ;;  %316 = vmatpush.msrb.mxu2 %v676_v27 }
  0x36   :  { %s749_s11 = spop %391  ;;  %293 = vmatpush.msra.mxu3 %v53_v3 }
  0x37   :  { %317 = vmatpush.msrb.mxu2 %v688_v29 }
  0x38   :  { %324 = vmatpush.msrb.mxu3 %v521_v2 }
  0x39   :  { %318 = vmatpush.msrb.mxu2 %v701_v31 }
  0x3a   :  { %325 = vmatpush.msrb.mxu3 %v539_v6 }
  0x3b   :  { %319 = vmatpush.msrb.mxu2 %v714_v33 }
  0x3c   :  { %326 = vmatpush.msrb.mxu3 %v553_v8  ;;  %v110_v8 = vstv %s749_s11 }
  0x3e   :  { %327 = vmatpush.msrb.mxu3 %v568_v10 }
  0x40   :  { %328 = vmatpush.msrb.mxu3 %v580_v12 }
  0x42   :  { %329 = vmatpush.msrb.mxu3 %v593_v14 }
  0x44   :  { %330 = vmatpush.msrb.mxu3 %v606_v16 }
  0x46   :  { %331 = vmatpush.msrb.mxu3 %v619_v18 }
  0x48   :  { %332 = vmatpush.msrb.mxu3 %v631_v20 }
  0x4a   :  { %333 = vmatpush.msrb.mxu3 %v644_v22 }
  0x4c   :  { %334 = vmatpush.msrb.mxu3 %v657_v24 }
  0x4e   :  { %335 = vmatpush.msrb.mxu3 %v670_v26  ;;  %v300_v26 = vrot.slane %v511_v0, 3 }
  0x50   :  { %336 = vmatpush.msrb.mxu3 %v682_v28 }
  0x52   :  { %337 = vmatpush.msrb.mxu3 %v695_v30 }
  0x54   :  { %338 = vmatpush.msrb.mxu3 %v708_v32 }
  0x56   :  { %339 = vmatpush.msrb.mxu3 %v721_v34 }
  0x5f   :  { %v141_v37 = vpop.permute.xlu2 %140 }
  0x67   :  { %v148_v38 = vpop.permute.xlu2 %147 }
  0x6f   :  { %v168_v42 = vpop.permute.xlu2 %167 }
  0x74   :  { %v115_v39 = vpop.permute.xlu0 %114 }
  0x75   :  { %393 = vpush %v115_v39 }
  0x76   :  { %v128_v40 = vpop.permute.xlu1 %127 }
  0x77   :  { %v188_v46 = vpop.permute.xlu2 %187 }
  0x7c   :  { %v121_v41 = vpop.permute.xlu0 %120 }
  0x7d   :  { %395 = vpush %v121_v41 }
  0x7e   :  { %397 = vpush %v128_v40  ;;  %v135_v43 = vpop.permute.xlu1 %134  ;;  %v104_v40 = vstv %s747_s10 }
  0x7f   :  { %399 = vpush %v135_v43  ;;  %v208_v49 = vpop.permute.xlu2 %207 }
  0x80   :  { %401 = vpush %v141_v37 }
  0x81   :  { %403 = vpush %v148_v38 }
  0x84   :  { %v155_v44 = vpop.permute.xlu0 %154 }
  0x85   :  { %405 = vpush %v155_v44 }
  0x86   :  { %v161_v45 = vpop.permute.xlu1 %160 }
  0x87   :  { %407 = vpush %v161_v45  ;;  %v228_v52 = vpop.permute.xlu2 %227 }
  0x88   :  { %409 = vpush %v168_v42 }
  0x8c   :  { %v175_v47 = vpop.permute.xlu0 %174 }
  0x8d   :  { %411 = vpush %v175_v47 }
  0x8e   :  { %v181_v48 = vpop.permute.xlu1 %180 }
  0x8f   :  { %413 = vpush %v181_v48  ;;  %v248_v56 = vpop.permute.xlu2 %247 }
  0x90   :  { %415 = vpush %v188_v46 }
  0x94   :  { %v195_v50 = vpop.permute.xlu0 %194 }
  0x95   :  { %417 = vpush %v195_v50 }
  0x96   :  { %v201_v51 = vpop.permute.xlu1 %200 }
  0x97   :  { %419 = vpush %v201_v51 }
  0x98   :  { %421 = vpush %v208_v49 }
  0x9c   :  { %v215_v53 = vpop.permute.xlu0 %214 }
  0x9d   :  { %423 = vpush %v215_v53 }
  0x9e   :  { %v221_v54 = vpop.permute.xlu1 %220  ;;  %v74_v58 = vpop.f32.mrf.mxu0 }
  0x9f   :  { %425 = vpush %v221_v54  ;;  %v94_v59 = vpop.f32.mrf.mxu1 }
  0xa0   :  { %427 = vpush %v228_v52  ;;  %v777_v4 = vadd.f32 %v94_v59, %v74_v58 }
  0xa2   :  { %v101_v37 = vmul.f32 %v99_v62, %v777_v4 }
  0xa4   :  { %v235_v55 = vpop.permute.xlu0 %234  ;;  %v106_v1 = vadd.f32 %v104_v40, %v101_v37 }
  0xa5   :  { %429 = vpush %v235_v55 }
  0xa6   :  { %v241_v57 = vpop.permute.xlu1 %240  ;;  %s751_s12 = spop %393  ;;  %v107_v50 = vmax.f32 %v106_v1, 0.0 }
  0xa7   :  { %431 = vpush %v241_v57  ;;  %v117_v38 = vstv %s751_s12  ;;  %s482_s12 = smov [#allocation2]  }
  0xa8   :  { %433 = vpush %v248_v56  ;;  %v119_v43 = vmul.f32 %v117_v38, %v777_v4  ;;  %v112_v11 = vmul.f32 %v110_v8, %v107_v50 }
  0xa9   :  { %435 = vpush %v300_v26 }
  0xae   :  { %s753_s13 = spop %395 }
  0xaf   :  { %s755_s14 = spop %397  ;;  %v123_v41 = vstv %s753_s13  ;;  %s374_s13 = sshll.u32 %s482_s12, 4  ;;  %s375_s13 = int_to_ptr.vmem [resolvable:$true] %s374_s13 }
  0xb0   :  { %s757_s15 = spop %399  ;;  %v125_v45 = vadd.f32 %v123_v41, %v119_v43  ;;  %v130_v55 = vstv %s755_s14 }
  0xb1   :  { %s759_s16 = spop %401  ;;  %v137_v39 = vstv %s757_s15 }
  0xb2   :  { %s761_s17 = spop %403  ;;  %v139_v44 = vmul.f32 %v137_v39, %v777_v4  ;;  %v143_v47 = vstv %s759_s16  ;;  %v126_v51 = vmax.f32 %v125_v45, 0.0  ;;  %s376_s16 = sshll.u32 %s858_s4, 4  ;;  %s377_s16 = int_to_ptr.hbm [resolvable:$true] %s376_s16 }
  0xb3   :  { %v150_v13 = vstv %s761_s17 }
  0xb4   :  { %v145_v6 = vadd.f32 %v143_v47, %v139_v44  ;;  %v132_v56 = vmul.f32 %v130_v55, %v126_v51 }
  0xb6   :  { %s769_s0 = spop %405  ;;  %v146_v9 = vmax.f32 %v145_v6, 0.0  ;;  %v133_v16 = vadd.f32 %v132_v56, %v112_v11 }
  0xb7   :  { %v157_v42 = vstv %s769_s0 }
  0xb8   :  { %s779_s26 = spop %407  ;;  %v159_v46 = vmul.f32 %v157_v42, %v777_v4  ;;  %v152_v61 = vmul.f32 %v150_v13, %v146_v9 }
  0xb9   :  { %s781_s27 = spop %409  ;;  %v163_v5 = vstv %s779_s26 }
  0xba   :  { %v165_v52 = vadd.f32 %v163_v5, %v159_v46  ;;  %v170_v14 = vstv %s781_s27  ;;  %v153_v17 = vadd.f32 %v152_v61, %v133_v16 }
  0xbc   :  { %v166_v57 = vmax.f32 %v165_v52, 0.0 }
  0xbe   :  { %s412_s28 = spop %411  ;;  %v172_v3 = vmul.f32 %v170_v14, %v166_v57 }
  0xbf   :  { %v177_v2 = vstv %s412_s28 }
  0xc0   :  { %s789_s3 = spop %413  ;;  %v179_v49 = vmul.f32 %v177_v2, %v777_v4  ;;  %v173_v19 = vadd.f32 %v172_v3, %v153_v17 }
  0xc1   :  { %s793_s29 = spop %415  ;;  %v183_v7 = vstv %s789_s3 }
  0xc2   :  { %v185_v10 = vadd.f32 %v183_v7, %v179_v49  ;;  %v190_v15 = vstv %s793_s29 }
  0xc4   :  { %v186_v62 = vmax.f32 %v185_v10, 0.0 }
  0xc6   :  { %s418_s30 = spop %417  ;;  %v192_v39 = vmul.f32 %v190_v15, %v186_v62 }
  0xc7   :  { %v197_v48 = vstv %s418_s30 }
  0xc8   :  { %s420_s5 = spop %419  ;;  %v199_v53 = vmul.f32 %v197_v48, %v777_v4  ;;  %v193_v21 = vadd.f32 %v192_v39, %v173_v19 }
  0xc9   :  { %v203_v54 = vstv %s420_s5  ;;  %s812_s6 = spop %421 }
  0xca   :  { %v205_v58 = vadd.f32 %v203_v54, %v199_v53  ;;  %v210_v38 = vstv %s812_s6 }
  0xcc   :  { %v206_v37 = vmax.f32 %v205_v58, 0.0 }
  0xce   :  { %s424_s7 = spop %423  ;;  %v212_v20 = vmul.f32 %v210_v38, %v206_v37 }
  0xcf   :  { %v217_v12 = vstv %s424_s7 }
  0xd0   :  { %v219_v59 = vmul.f32 %v217_v12, %v777_v4  ;;  %s426_s2 = spop %425  ;;  %v213_v23 = vadd.f32 %v212_v20, %v193_v21 }
  0xd1   :  { %v223_v60 = vstv %s426_s2  ;;  %s428_s8 = spop %427 }
  0xd2   :  { %v225_v63 = vadd.f32 %v223_v60, %v219_v59  ;;  %v230_v40 = vstv %s428_s8 }
  0xd4   :  { %v226_v18 = vmax.f32 %v225_v63, 0.0 }
  0xd6   :  { %s430_s1 = spop %429  ;;  %v232_v22 = vmul.f32 %v230_v40, %v226_v18 }
  0xd7   :  { %v237_v41 = vstv %s430_s1 }
  0xd8   :  { %v239_v42 = vmul.f32 %v237_v41, %v777_v4  ;;  %s432_s9 = spop %431  ;;  %v233_v4 = vadd.f32 %v232_v22, %v213_v23 }
  0xd9   :  { %v243_v43 = vstv %s432_s9  ;;  %s434_s10 = spop %433 }
  0xda   :  { %v245_v44 = vadd.f32 %v243_v43, %v239_v42  ;;  %v250_v1 = vstv %s434_s10  ;;  %s436_s11 = spop %435 }
  0xdb   :  { %v302_v31 = vstv %s436_s11 }
  0xdc   :  { %v246_v24 = vmax.f32 %v245_v44, 0.0 }
  0xde   :  { %v252_v2 = vmul.f32 %v250_v1, %v246_v24 }
  0xe0   :  { %v253_v25 = vadd.f32 %v252_v2, %v233_v4 }
  0xe2   :  { %385 = vmatmul.msk.f32.vlgmr.msra.gmra.mxu2 %vm254_vm0, %v253_v25  ;;  %386 = vmatmul.msk.f32.vlgmr.msra.gmra.mxu3 %vm254_vm0, %v253_v25 }
 0x165   :  { %v275_v27 = vpop.f32.mrf.mxu2  ;;  %v295_v28 = vpop.f32.mrf.mxu3 }
 0x166   :  { %v298_v29 = vmul.f32 %v275_v27, %v726_v35  ;;  %v299_v30 = vmul.f32 %v295_v28, %v732_v36 }
 0x168   :  { %320 = vmatmul.f32.vlgmr.msrb.gmra.mxu2 %v298_v29  ;;  %340 = vmatmul.f32.vlgmr.msrb.gmra.mxu3 %v299_v30 }
 0x1eb   :  { %v321_v32 = vpop.f32.mrf.mxu2  ;;  %v341_v34 = vpop.f32.mrf.mxu3 }
 0x1ec   :  { %v322_v33 = vadd.f32 %v321_v32, %v302_v31 }
 0x1ee   :  { %v342_v45 = vadd.f32 %v341_v34, %v322_v33 }
 0x1f0   :  { %v344_v46 = vsel %vm254_vm0, %v342_v45, -inf }
 0x1f1   :  { %345 = vmax.xlane.f32.xlu0 %v344_v46 }
 0x264   :  { %v346_v47 = vpop.xlane.xlu0 %345 }
 0x265   :  { %v347_v0 = vsub.f32 %v342_v45, %v346_v47 }
 0x267   :  { %v348_v5 = vmul.f32 1.442695, %v347_v0 }
 0x269   :  { %445 = vpow2.f32 %v348_v5 }
 0x26f   :  { %v446_v48 = vpop.eup %445 }
 0x270   :  { %v350_v35 = vsel %vm254_vm0, %v446_v48, 0.0 }
 0x271   :  { %351 = vadd.xlane.f32.xlu1 %v350_v35 }
 0x2e4   :  { %v352_v36 = vpop.xlane.xlu1 %351 }
 0x2e5   :  { %447 = vrcp.f32 %v352_v36  ;;  %v364_v7 = vand.u32 2147483648, %v352_v36  ;;  %v362_v51 = vand.u32 2147483647, %v352_v36  ;;  %vm358_vm2 = vweird.f32 %v352_v36 }
 0x2e7   :  { %v365_v53 = vor.u32 1.1754944e-38, %v364_v7  ;;  %vm363_vm4 = vcmp.eq.f32.partialorder %v362_v51, 8.507059e+37 }
 0x2eb   :  { %v448_v6 = vpop.eup %447 }
 0x2ec   :  { %v354_v49 = vmul.f32 %v448_v6, %v352_v36  ;;  %vm359_vm1 = vweird.f32 %v448_v6 }
 0x2ed   :  { %vm360_vm3 = vmor %vm358_vm2, %vm359_vm1 }
 0x2ee   :  { %v355_v50 = vsub.f32 1.0, %v354_v49 }
 0x2f0   :  { %v356_v8 = vmul.f32 %v448_v6, %v355_v50 }
 0x2f2   :  { %v357_v52 = vadd.f32 %v448_v6, %v356_v8 }
 0x2f4   :  { %v361_v54 = vsel %vm360_vm3, %v448_v6, %v357_v52 }
 0x2f5   :  { %v366_v9 = vsel %vm363_vm4, %v365_v53, %v361_v54 }
 0x2f6   :  { %v367_v10 = vmul.f32 %v446_v48, %v366_v9 }
 0x2f8   :  { %368 = vst.msk [vmem:[#allocation2] sm:$0xff] %vm254_vm0, %v367_v10 }
 0x2f9   :  { %379 = dma.vmem_to_hbm [thread:$0]  %s375_s13, 128, %s377_s16, [#allocation3]  }
 0x2fa   :  { %473 = dma.done.wait [#allocation3], 128  }
 0x2fb   :  { %474 = vsyncadd [#allocation3], 4294967168 }
 0x2fc   :  { %384 = vsyncpa [#allocation3], 1 }

</bundles_post_ra>
